<compile_context>
chip_gen: v6e
topology: v6e:2x2x1
jax: 0.10.0
libtpu: 0.0.40
codegen_flags: <defaults>
</compile_context>

<pallas_src>
import functools

import jax
import jax.numpy as jnp
from jax.experimental import pallas as pl
from jax.experimental.pallas import tpu as pltpu

EPS = 1e-5
VMEM_LIMIT = 32 * 1024 * 1024  # safe on v5e (16 phys-scoped default raised), v6e, v7x


# ----------------------------------------------------------------------------
# Fused tiled matmul + BN-affine (+residual) (+ReLU) Pallas kernel
# ----------------------------------------------------------------------------
def _fused_matmul_kernel(*refs, relu, has_res):
    if has_res:
        a_ref, b_ref, scale_ref, shift_ref, res_ref, o_ref, acc_ref = refs
    else:
        a_ref, b_ref, scale_ref, shift_ref, o_ref, acc_ref = refs
        res_ref = None
    k = pl.program_id(2)

    @pl.when(k == 0)
    def _():
        acc_ref[...] = jnp.zeros_like(acc_ref)

    acc_ref[...] += jnp.dot(a_ref[...], b_ref[...],
                            preferred_element_type=jnp.float32)

    @pl.when(k == pl.num_programs(2) - 1)
    def _():
        y = acc_ref[...] * scale_ref[...] + shift_ref[...]
        if has_res:
            y = y + res_ref[...]
        if relu:
            y = jnp.maximum(y, 0.0)
        o_ref[...] = y


def _round_up(x, m):
    return (x + m - 1) // m * m


def _choose_tile(dim, align, max_tile):
    """Return (tile, padded_dim): tile is a multiple of `align`, <= max_tile,
    and divides padded_dim exactly (padding kept minimal)."""
    padded = _round_up(dim, align)
    if padded <= max_tile:
        return padded, padded
    tile = align
    for cand in range(max_tile, align - 1, -align):
        if padded % cand == 0:
            tile = cand
            break
    return tile, padded


def fused_matmul_bn(a, b_bf16, scale, shift, res=None, relu=True,
                    tm_max=256, tn_max=256, tk_max=512):
    """(M,K) @ (K,N) with fused  y = out*scale + shift (+res) (+ReLU).

    a        : (M, K)   float32 (cast to bf16 here)
    b_bf16   : (K, N)   bfloat16 (precomputed weight matrix)
    scale    : (1, N)   float32
    shift    : (1, N)   float32
    res      : (M, N)   float32 or None
    """
    M, K = a.shape
    Kb, N = b_bf16.shape
    assert K == Kb

    tm, Mp = _choose_tile(M, 16, tm_max)
    tn, Np = _choose_tile(N, 128, tn_max)
    tk, Kp = _choose_tile(K, 128, tk_max)

    a_p = jnp.pad(a, ((0, Mp - M), (0, Kp - K))).astype(jnp.bfloat16)
    b_p = jnp.pad(b_bf16, ((0, Kp - K), (0, Np - N)))
    scale_p = jnp.pad(scale, ((0, 0), (0, Np - N)))
    shift_p = jnp.pad(shift, ((0, 0), (0, Np - N)))

    in_specs = [
        pl.BlockSpec((tm, tk), lambda i, j, k: (i, k)),
        pl.BlockSpec((tk, tn), lambda i, j, k: (k, j)),
        pl.BlockSpec((1, tn), lambda i, j, k: (0, j)),
        pl.BlockSpec((1, tn), lambda i, j, k: (0, j)),
    ]
    args = [a_p, b_p, scale_p, shift_p]
    has_res = res is not None
    if has_res:
        res_p = jnp.pad(res, ((0, Mp - M), (0, Np - N))).astype(jnp.float32)
        in_specs.append(pl.BlockSpec((tm, tn), lambda i, j, k: (i, j)))
        args.append(res_p)

    grid = (Mp // tm, Np // tn, Kp // tk)

    out = pl.pallas_call(
        functools.partial(_fused_matmul_kernel, relu=relu, has_res=has_res),
        out_shape=jax.ShapeDtypeStruct((Mp, Np), jnp.float32),
        grid_spec=pltpu.PrefetchScalarGridSpec(
            num_scalar_prefetch=0,
            grid=grid,
            in_specs=in_specs,
            out_specs=pl.BlockSpec((tm, tn), lambda i, j, k: (i, j)),
            scratch_shapes=[pltpu.VMEM((tm, tn), jnp.float32)],
        ),
        compiler_params=pltpu.CompilerParams(
            dimension_semantics=("parallel", "parallel", "arbitrary"),
            vmem_limit_bytes=VMEM_LIMIT,
        ),
    )(*args)
    return out[:M, :N]


# ----------------------------------------------------------------------------
# Conv (+BN+ReLU+residual) wrapper: im2col glue + fused Pallas kernel
# ----------------------------------------------------------------------------
def conv_bn(x_nhwc, w_mat, kh, kw, stride, padding, scale, shift,
            relu=True, res=None):
    # TODO(synk): im2col patch extraction is plain-JAX glue; a fully in-kernel
    # version would drive the K-reduction grid over the KH*KW taps to avoid
    # materializing the patch tensor in HBM.
    N, H, W, Cin = x_nhwc.shape
    Cout = w_mat.shape[1]
    Ho = (H + 2 * padding - kh) // stride + 1
    Wo = (W + 2 * padding - kw) // stride + 1

    if kh == 1 and kw == 1 and padding == 0:
        a = x_nhwc[:, ::stride, ::stride, :].reshape(N * Ho * Wo, Cin)
    else:
        xp = jnp.pad(x_nhwc,
                     ((0, 0), (padding, padding), (padding, padding), (0, 0)))
        cols = [xp[:, i:i + stride * Ho:stride, j:j + stride * Wo:stride, :]
                for i in range(kh) for j in range(kw)]
        a = jnp.stack(cols, axis=3).reshape(N * Ho * Wo, kh * kw * Cin)

    res2d = None if res is None else res.reshape(N * Ho * Wo, Cout)
    out = fused_matmul_bn(a, w_mat, scale, shift, res=res2d, relu=relu)
    return out.reshape(N, Ho, Wo, Cout)


def maxpool_3x3_s2(x_nhwc):
    # TODO(synk): 3x3/s2 max-pool left in plain JAX (lax.reduce_window); it is
    # a tiny fraction of the work compared to the conv matmuls.
    return jax.lax.reduce_window(
        x_nhwc, -jnp.inf, jax.lax.max,
        window_dimensions=(1, 3, 3, 1),
        window_strides=(1, 2, 2, 1),
        padding=((0, 0), (1, 1), (1, 1), (0, 0)))


# ----------------------------------------------------------------------------
# ResNet-18 forward
# ----------------------------------------------------------------------------
def basic_block(x, p):
    if 'down_w' in p:
        identity = conv_bn(x, p['down_w'], 1, 1, p['stride'], 0,
                           p['down_scale'], p['down_shift'], relu=False)
    else:
        identity = x
    out = conv_bn(x, p['w1'], 3, 3, p['stride'], 1,
                  p['scale1'], p['shift1'], relu=True)
    # conv2 + bn2 + residual add + ReLU fused into one kernel epilogue
    out = conv_bn(out, p['w2'], 3, 3, 1, 1,
                  p['scale2'], p['shift2'], relu=True, res=identity)
    return out


def resnet18_forward(x_nchw, params):
    # NCHW (PyTorch) -> NHWC (channel on the 128-lane axis)
    x = jnp.transpose(x_nchw, (0, 2, 3, 1)).astype(jnp.float32)

    x = conv_bn(x, params['w1'], 7, 7, 2, 3,
                params['scale1'], params['shift1'], relu=True)   # 7x7 / s2 + BN + ReLU
    x = maxpool_3x3_s2(x)

    for layer in ('layer1', 'layer2', 'layer3', 'layer4'):
        for blk in params[layer]:
            x = basic_block(x, blk)

    # TODO(synk): adaptive avg-pool to (1,1) is a tiny reduction, left in JAX.
    pooled = jnp.mean(x, axis=(1, 2))                            # (N, 512)

    # fc: Linear(512, 5) -> same fused Pallas matmul (scale=1, shift=bias)
    logits = fused_matmul_bn(pooled, params['fc_w'],
                             params['fc_scale'], params['fc_b'], relu=False)
    return logits


# ----------------------------------------------------------------------------
# Parameter preparation (done once, outside the kernels)
# ----------------------------------------------------------------------------
def _conv_to_mat(w_oihw):
    cout = w_oihw.shape[0]
    return (jnp.transpose(w_oihw, (2, 3, 1, 0))
            .reshape(-1, cout).astype(jnp.bfloat16))


def _bn_to_scale_shift(bn):
    gamma, beta, mean, var = bn
    scale = gamma / jnp.sqrt(var + EPS)
    shift = beta - mean * scale
    return scale.reshape(1, -1).astype(jnp.float32), \
           shift.reshape(1, -1).astype(jnp.float32)


def prepare_params(raw):
    def prep_block(b):
        p = {'stride': b['stride'],
             'w1': _conv_to_mat(b['conv1']),
             'w2': _conv_to_mat(b['conv2'])}
        p['scale1'], p['shift1'] = _bn_to_scale_shift(b['bn1'])
        p['scale2'], p['shift2'] = _bn_to_scale_shift(b['bn2'])
        if 'down_conv' in b:
            p['down_w'] = _conv_to_mat(b['down_conv'])
            p['down_scale'], p['down_shift'] = _bn_to_scale_shift(b['down_bn'])
        return p

    out = {'w1': _conv_to_mat(raw['conv1'])}
    out['scale1'], out['shift1'] = _bn_to_scale_shift(raw['bn1'])
    for layer in ('layer1', 'layer2', 'layer3', 'layer4'):
        out[layer] = [prep_block(b) for b in raw[layer]]
    out['fc_w'] = raw['fc_w'].T.astype(jnp.bfloat16)             # (512, 5)
    out['fc_b'] = raw['fc_b'].reshape(1, -1).astype(jnp.float32)
    out['fc_scale'] = jnp.ones((1, raw['fc_w'].shape[0]), jnp.float32)
    return out


# ----------------------------------------------------------------------------
# Deterministic parameter init (shapes of torchvision resnet18, fc -> 5 classes)
# ----------------------------------------------------------------------------
def init_resnet18_params(key, num_classes=5):
    keys = iter(jax.random.split(key, 64))

    def conv(cout, cin, k):
        fan_in = cin * k * k
        return jax.random.normal(next(keys), (cout, cin, k, k),
                                 jnp.float32) * (2.0 / fan_in) ** 0.5

    def bn(c):
        # (gamma, beta, running_mean, running_var) -- PyTorch default init
        return (jnp.ones((c,), jnp.float32), jnp.zeros((c,), jnp.float32),
                jnp.zeros((c,), jnp.float32), jnp.ones((c,), jnp.float32))

    def block(cin, cout, stride):
        p = {'stride': stride,
             'conv1': conv(cout, cin, 3), 'bn1': bn(cout),
             'conv2': conv(cout, cout, 3), 'bn2': bn(cout)}
        if stride != 1 or cin != cout:
            p['down_conv'] = conv(cout, cin, 1)
            p['down_bn'] = bn(cout)
        return p

    params = {
        'conv1': conv(64, 3, 7),
        'bn1': bn(64),
        'layer1': [block(64, 64, 1), block(64, 64, 1)],
        'layer2': [block(64, 128, 2), block(128, 128, 1)],
        'layer3': [block(128, 256, 2), block(256, 256, 1)],
        'layer4': [block(256, 512, 2), block(512, 512, 1)],
        'fc_w': jax.random.normal(next(keys), (num_classes, 512),
                                  jnp.float32) * (1.0 / 512.0) ** 0.5,
        'fc_b': jnp.zeros((num_classes,), jnp.float32),
    }
    return params


if __name__ == "__main__":
    key = jax.random.PRNGKey(0)
    pkey, xkey = jax.random.split(key)
    raw_params = init_resnet18_params(pkey, num_classes=5)
    params = prepare_params(raw_params)

    # Small image batch, NCHW like PyTorch (32x32 is the smallest size that
    # survives the /32 total stride of ResNet-18).
    x = jax.random.normal(xkey, (2, 3, 32, 32), jnp.float32)

    logits = resnet18_forward(x, params)
    logits = jax.block_until_ready(logits)
    assert logits.shape == (2, 5), logits.shape
    assert bool(jnp.all(jnp.isfinite(logits)))
    print("KERNEL_OK")
</pallas_src>

<mosaic_0001>
module attributes {stable_mosaic.version = 11 : i64} {
  func.func @_fused_matmul_kernel(%arg0: i32, %arg1: i32, %arg2: i32, %arg3: memref<256x256xbf16, #tpu.memory_space<vmem>>, %arg4: memref<256x128xbf16, #tpu.memory_space<vmem>>, %arg5: memref<1x128xf32, #tpu.memory_space<vmem>>, %arg6: memref<1x128xf32, #tpu.memory_space<vmem>>, %arg7: memref<256x128xf32, #tpu.memory_space<vmem>>, %arg8: memref<256x128xf32, #tpu.memory_space<vmem>>) attributes {dimension_semantics = [#tpu.dimension_semantics<parallel>, #tpu.dimension_semantics<parallel>, #tpu.dimension_semantics<arbitrary>], iteration_bounds = array<i64: 2, 1, 1>, scalar_prefetch = 0 : i64, scratch_operands = 1 : i64, tpu.core_type = #tpu.core_type<tc>, window_params = [{transform_indices = @transform_0, window_bounds = array<i64: 256, 256>}, {transform_indices = @transform_1, window_bounds = array<i64: 256, 128>}, {transform_indices = @transform_2, window_bounds = array<i64: 1, 128>}, {transform_indices = @transform_3, window_bounds = array<i64: 1, 128>}, {transform_indices = @transform_4, window_bounds = array<i64: 256, 128>}]} {
    %c0_i32 = arith.constant 0 : i32
    %0 = arith.cmpi eq, %arg2, %c0_i32 : i32
    %1 = arith.extui %0 : i1 to i32
    %c0_i32_0 = arith.constant 0 : i32
    %2 = arith.cmpi ne, %1, %c0_i32_0 : i32
    scf.if %2 {
      %cst_10 = arith.constant 0.000000e+00 : f32
      %12 = vector.broadcast %cst_10 : f32 to vector<256x128xf32>
      %c0_11 = arith.constant 0 : index
      %c0_12 = arith.constant 0 : index
      %13 = vector.load %arg8[%c0_11, %c0_12] : memref<256x128xf32, #tpu.memory_space<vmem>>, vector<256x128xf32>
      tpu.vector_store %arg8[%c0_11, %c0_12], %12 {strides = array<i32>} : memref<256x128xf32, #tpu.memory_space<vmem>>, vector<256x128xf32>,
    } else {
    }
    %c0 = arith.constant 0 : index
    %c0_1 = arith.constant 0 : index
    %3 = vector.load %arg8[%c0, %c0_1] : memref<256x128xf32, #tpu.memory_space<vmem>>, vector<256x128xf32>
    %c0_2 = arith.constant 0 : index
    %c0_3 = arith.constant 0 : index
    %4 = vector.load %arg3[%c0_2, %c0_3] : memref<256x256xbf16, #tpu.memory_space<vmem>>, vector<256x256xbf16>
    %c0_4 = arith.constant 0 : index
    %c0_5 = arith.constant 0 : index
    %5 = vector.load %arg4[%c0_4, %c0_5] : memref<256x128xbf16, #tpu.memory_space<vmem>>, vector<256x128xbf16>
    %cst = arith.constant dense<0.000000e+00> : vector<256x128xf32>
    %6 = tpu.matmul %4, %5, %cst {dimension_numbers = #tpu.dot_dimension_numbers<[1], [0], [0], [1], [0, 0, 1, 1], [], []>} : vector<256x256xbf16>, vector<256x128xbf16>, vector<256x128xf32> -> vector<256x128xf32>
    %7 = arith.addf %3, %6 : vector<256x128xf32>
    %c0_6 = arith.constant 0 : index
    %c0_7 = arith.constant 0 : index
    %8 = vector.load %arg8[%c0_6, %c0_7] : memref<256x128xf32, #tpu.memory_space<vmem>>, vector<256x128xf32>
    tpu.vector_store %arg8[%c0_6, %c0_7], %7 {strides = array<i32>} : memref<256x128xf32, #tpu.memory_space<vmem>>, vector<256x128xf32>,
    %c0_i32_8 = arith.constant 0 : i32
    %9 = arith.cmpi eq, %arg2, %c0_i32_8 : i32
    %10 = arith.extui %9 : i1 to i32
    %c0_i32_9 = arith.constant 0 : i32
    %11 = arith.cmpi ne, %10, %c0_i32_9 : i32
    scf.if %11 {
      %c0_10 = arith.constant 0 : index
      %c0_11 = arith.constant 0 : index
      %12 = vector.load %arg8[%c0_10, %c0_11] : memref<256x128xf32, #tpu.memory_space<vmem>>, vector<256x128xf32>
      %c0_12 = arith.constant 0 : index
      %c0_13 = arith.constant 0 : index
      %13 = vector.load %arg5[%c0_12, %c0_13] : memref<1x128xf32, #tpu.memory_space<vmem>>, vector<1x128xf32>
      %14 = vector.broadcast %13 : vector<1x128xf32> to vector<256x128xf32>
      %15 = arith.mulf %12, %14 : vector<256x128xf32>
      %c0_14 = arith.constant 0 : index
      %c0_15 = arith.constant 0 : index
      %16 = vector.load %arg6[%c0_14, %c0_15] : memref<1x128xf32, #tpu.memory_space<vmem>>, vector<1x128xf32>
      %17 = vector.broadcast %16 : vector<1x128xf32> to vector<256x128xf32>
      %18 = arith.addf %15, %17 : vector<256x128xf32>
      %cst_16 = arith.constant 0.000000e+00 : f32
      %19 = vector.broadcast %cst_16 : f32 to vector<256x128xf32>
      %20 = arith.maximumf %18, %19 : vector<256x128xf32>
      %c0_17 = arith.constant 0 : index
      %c0_18 = arith.constant 0 : index
      %21 = vector.load %arg7[%c0_17, %c0_18] : memref<256x128xf32, #tpu.memory_space<vmem>>, vector<256x128xf32>
      tpu.vector_store %arg7[%c0_17, %c0_18], %20 {strides = array<i32>} : memref<256x128xf32, #tpu.memory_space<vmem>>, vector<256x128xf32>,
    } else {
    }
    return
  }
  func.func @transform_0(%arg0: i32, %arg1: i32, %arg2: i32) -> (i32, i32) {
    %c0_i32 = arith.constant 0 : i32
    return %arg0, %arg2 : i32, i32
  }
  func.func @transform_1(%arg0: i32, %arg1: i32, %arg2: i32) -> (i32, i32) {
    %c0_i32 = arith.constant 0 : i32
    return %arg2, %arg1 : i32, i32
  }
  func.func @transform_2(%arg0: i32, %arg1: i32, %arg2: i32) -> (i32, i32) {
    %c0_i32 = arith.constant 0 : i32
    %c0_i32_0 = arith.constant 0 : i32
    return %c0_i32, %arg1 : i32, i32
  }
  func.func @transform_3(%arg0: i32, %arg1: i32, %arg2: i32) -> (i32, i32) {
    %c0_i32 = arith.constant 0 : i32
    %c0_i32_0 = arith.constant 0 : i32
    return %c0_i32, %arg1 : i32, i32
  }
  func.func @transform_4(%arg0: i32, %arg1: i32, %arg2: i32) -> (i32, i32) {
    %c0_i32 = arith.constant 0 : i32
    return %arg0, %arg1 : i32, i32
  }
}

</mosaic_0001>

<bundles_post_ra>
// kernel: tpu_custom_call.1
= control target key start
LH: loop header
LB: loop body
LE: loop exit
PB: predicated region body
PF: predicated region fallthrough
CT: control target
= control target key end

     0   :  { %s2079_s0 = inlined_call_operand.hbm [shape: bf16[512,256], index: 0, kind: input, shape index: {}]   ;;  %s2080_s1 = inlined_call_operand.hbm [shape: bf16[256,128], index: 1, kind: input, shape index: {}]   ;;  %s2081_s2 = inlined_call_operand.vmem [shape: f32[1,128], index: 2, kind: input, shape index: {}]   ;;  %s2082_s3 = inlined_call_operand.vmem [shape: f32[1,128], index: 3, kind: input, shape index: {}]   ;;  %s2083_s4 = inlined_call_operand.hbm [shape: f32[512,128], index: 4, kind: output, shape index: {}]  }
   0x1   :  { %2085 = sst [smem:[#allocation12_spill]] %s2080_s1 }
   0x2   :  { %9 = vsyncpa [#allocation4], 0 }
   0x3   :  { %11 = vsyncpa [#allocation4 + $0x1], 0 }
   0x4   :  { %12 = vsyncpa [#allocation7], 0 }
   0x5   :  { %13 = vsyncpa [#allocation5], 0 }
   0x6   :  { %15 = vsyncpa [#allocation5 + $0x1], 0  ;;  %s1751_s15 = smov 0   ;;  %s1753_s16 = smov 0  }
   0x7   :  { %s1755_s17 = smov 0   ;;  %s1757_s18 = smov 0  }
   0x8   :  { %s1759_s19 = smov 0   ;;  %s1761_s20 = smov 0  }
   0x9 LB: > { %s1233_s21 = sadd.s32 4294967295, %s1715_s20   ;;  %s1234_s22 = sadd.s32 4294967294, %s1715_s20   ;;  %s1715_s20 = sphi %s1761_s20, %s21_s20   ;;  %s1711_s19 = sphi %s1759_s19, %s2103_s19   ;;  %s1707_s18 = sphi %s1757_s18, %s2102_s18   ;;  %s1703_s17 = sphi %s1755_s17, %s2101_s17   ;;  %s1699_s16 = sphi %s1753_s16, %s2100_s16   ;;  %s1695_s15 = sphi %s1751_s15, %s2099_s15  }
   0xa   : > { %p62_p0 = scmp.ne.s32.totalorder %s1699_s16, %s1695_s15  ;;  %p1785_p1 = scmp.eq.s32.totalorder %s1233_s21, 0 }
   0xb   : > { %p1789_p2 = scmp.eq.s32.totalorder %s1233_s21, 1  ;;  %p174_p3 = scmp.eq.s32.totalorder %s1234_s22, 1 }
   0xc   : > { %p1795_p4 = por %p1785_p1, %p62_p0  ;;  %p1235_p5 = scmp.ge.s32.totalorder %s1715_s20, 1 }
   0xd   : > { %p1800_p6 = por %p174_p3, %p62_p0  ;;  %p181_p7 = scmp.lt.s32.totalorder %s1715_s20, 3 }
   0xe   : > { %s2088_s25 = scalar_select %p1795_p4, 1, 0 }
   0xf   : > { %s2089_s26 = scalar_select %p1800_p6, 1, 0 }
  0x10   : > { %p1805_p8 = pnand %p1235_p5, %p181_p7  ;;  %s1717_s28 = smov [#allocation6]  }
  0x11   : > { %s197_s29 = sshll.u32 %s1717_s28, 4  ;;  %s40_s5 = sadd.s32 1, %s1711_s19  ;;  %s198_s29 = int_to_ptr.vmem [resolvable:$true] %s197_s29 }
  0x12   : > { %p1442_p9 = pneg %p1805_p8  ;;  %s1588_s6 = scalar_lea.vmem %s198_s29, 2048 }
  0x13   : > { %p1589_p13 = scmp.ne.s32.totalorder %s198_s29, %s1588_s6  ;;  %p1596_p5 = scmp.lt.s32.totalorder %s198_s29, %s198_s29 }
  0x14   : > { %p1814_p11 = pnand %p1442_p9, %p1785_p1  ;;  %p1597_p7 = scmp.lt.s32.totalorder %s1588_s6, %s1588_s6 }
  0x16   : > { %p1579_p12 = pneg %p1814_p11  ;;  %p1598_p6 = por %p1597_p7, %p1596_p5 }
  0x18   : > { %p1591_p0 = pnand %p1589_p13, %p1579_p12 }
  0x1a   : > { %p1592_p3 = pneg %p1591_p0 }
  0x1c   : > { %p1599_p4 = pnand %p1598_p6, %p1592_p3 }
  0x1e   : > { %1602 = shalt.err (!%p1599_p4)
}
  0x1f   : > { %s1718_s7 = smov 64   ;;  %s1719_s8 = smov 4  }
  0x20   : > { %s2092_s1 = sld [smem:[#allocation12_spill]]  ;;  %p42_p6 = scmp.ge.s32.totalorder %s40_s5, 2 }
  0x21   : > { %s49_s11 = sadd.s32 1, %s1703_s17  ;;  %p56_p4 = scmp.ne.s32.totalorder %s1703_s17, %s1699_s16 }
  0x22   : > { %p57_p9 = scmp.eq.s32.totalorder %s1715_s20, 0  ;;  %s2105_s5 = smov (%p42_p6, %s40_s5), 0 }
  0x23   : > { %p1838_p13 = por %p1789_p2, %p56_p4  ;;  %s44_s14 = ssub.s32 %s1711_s19, %s2105_s5 }
  0x24   : > { %p1832_p12 = por %p57_p9, %p56_p4  ;;  %p1455_p0 = scmp.lt.s32.totalorder %s1715_s20, 2 }
  0x25   : > { %s223_s21 = sand.u32 1, %s1703_s17  }
  0x26   : > { %1445 = dma.hbm_to_vmem [thread:$0]  (!%p1814_p11), %s2092_s1, 2048, %s198_s29, [#allocation7], %s1718_s7, %s1718_s7, %s1719_s8  }
  0x27   : > { %p47_p11 = scmp.eq.s32.totalorder %s44_s14, 0  ;;  %s1240_s22 = sshll.u32 %s223_s21, 8 }
  0x28   : > { %s1304_s29 = sshll.u32 %s1711_s19, 12  ;;  %s227_s8 = scalar_lea.vmem [#allocation3], %s1240_s22 }
  0x29   : > { %s1847_s28 = scalar_select %p47_p11, %s1703_s17, %s49_s11  }
  0x2a   : > { %s236_s7 = scalar_lea.hbm %s2079_s0, %s1304_s29  ;;  %s237_s9 = sshll.u32 %s227_s8, 4  ;;  %s238_s9 = int_to_ptr.vmem [resolvable:$true] %s237_s9 }
  0x2b   : > { %p1855_p2 = pnand %p1455_p0, %p1832_p12  ;;  %s224_s10 = scalar_lea.sflag [#allocation4], %s223_s21 }
  0x2c   : > { %s1616_s14 = scalar_lea.vmem %s238_s9, 4096  ;;  %s1720_s11 = smov [#allocation3]  }
  0x2d   : > { %p1605_p3 = pneg %p1855_p2  ;;  %p1617_p5 = scmp.ne.s32.totalorder %s238_s9, %s1616_s14 }
  0x2e   : > { %s1621_s1 = sshll.u32 %s1720_s11, 4  ;;  %s1622_s1 = int_to_ptr.vmem [resolvable:$false] %s1621_s1 }
  0x2f   : > { %p1619_p7 = pnand %p1617_p5, %p1605_p3  ;;  %s1623_s29 = scalar_lea.vmem %s1622_s1, 8192 }
  0x30   : > { %p1624_p4 = scmp.lt.s32.totalorder %s238_s9, %s1622_s1  ;;  %p1625_p9 = scmp.lt.s32.totalorder %s1623_s29, %s1616_s14 }
  0x31   : > { %p1620_p6 = pneg %p1619_p7 }
  0x32   : > { %p1626_p11 = por %p1625_p9, %p1624_p4 }
  0x34   : > { %p1627_p10 = pnand %p1626_p11, %p1620_p6 }
  0x36   : > { %1630 = shalt.err (!%p1627_p10)
}
  0x37   : > { %s1721_s12 = smov 128   ;;  %s1722_s22 = smov 8  }
  0x38   : > { %1449 = dma.hbm_to_vmem [thread:$0]  (!%p1855_p2), %s236_s7, 4096, %s238_s9, %s224_s10, %s1721_s12, %s1721_s12, %s1722_s22  }
  0x39   : > { %249 = sbr.rel (%p1805_p8) target bundleno = 375 (0x177), region = 36  ;;  %s1866_s21 = sand.u32 (!%p1805_p8), 1, %s1699_s16  }
  0x3a   : > { %s1245_s1 = sshll.u32 (!%p1805_p8), %s1866_s21, 8  ;;  %s252_s30 = scalar_lea.sflag (!%p1805_p8), [#allocation4], %s1866_s21 }
  0x3b   : > { %s1872_s6 = scalar_lea.vmem (!%p1805_p8), [#allocation3], %s1245_s1  ;;  %p2096_p10 = scmp.ne.s32.totalorder (!%p1805_p8), %s2088_s25, 0 }
  0x3e   : > { %1682 = dma.done.wait (%p2096_p10), %s252_s30, 4096  }
  0x3f   : > { %1684 = vsyncadd (%p2096_p10), %s252_s30, 4294963200 }
  0x40   : > { %1686 = dma.done.wait (%p1785_p1), [#allocation7], 2048  }
  0x41   : > { %1688 = vsyncadd (%p1785_p1), [#allocation7], 4294965248  ;;  %v1513_v0 = vld [vmem:[#allocation6 + $0x78] sm:$0xff]   ;;  %v1515_v2 = vld [vmem:[#allocation6 + $0x70] sm:$0xff]   ;;  %s1932_s8 = scalar_lea.vmem [#allocation8], %s1245_s1  ;;  %s1305_s9 = sshll.u32 %s1707_s18, 12 }
  0x42   : > { %v1514_v1 = vld [vmem:[#allocation6 + $0x38] sm:$0xff]   ;;  %1306 = vmatprep.subr.bf16.mxu0 %v1513_v0  ;;  %1418 = vmatprep.subr.bf16.mxu1 %v1513_v0  ;;  %v1516_v3 = vld [vmem:[#allocation6 + $0x30] sm:$0xff]   ;;  %v1517_v4 = vld [vmem:[#allocation6 + $0x68] sm:$0xff]   ;;  %s1106_s24 = sshll.u32 %s1932_s8, 4  ;;  %s2027_s11 = scalar_lea.hbm %s2083_s4, %s1305_s9  ;;  %s2029_s24 = int_to_ptr.vmem [resolvable:$true] %s1106_s24 }
  0x43   : > { %1307 = vmatpush3.bf16.msra.mxu0 %v1514_v1  ;;  %1426 = vmatpush3.bf16.msra.mxu1 %v1514_v1  ;;  %v1518_v5 = vld [vmem:[#allocation6 + $0x28] sm:$0xff]   ;;  %v1519_v6 = vld [vmem:[#allocation6 + $0x60] sm:$0xff]   ;;  %v1521_v8 = vld [vmem:[#allocation6 + $0x58] sm:$0xff]   ;;  %s1092_s18 = scalar_lea.sflag [#allocation5], %s1866_s21  ;;  %s1631_s29 = scalar_lea.vmem %s2029_s24, 4096 }
  0x44   : > { %1308 = vmatprep.subr.bf16.mxu0 %v1515_v2  ;;  %1419 = vmatprep.subr.bf16.mxu1 %v1515_v2  ;;  %v1520_v7 = vld [vmem:[#allocation6 + $0x20] sm:$0xff]   ;;  %v1522_v9 = vld [vmem:[#allocation6 + $0x18] sm:$0xff]   ;;  %v1523_v10 = vld [vmem:[#allocation6 + $0x50] sm:$0xff]   ;;  %p1632_p1 = scmp.ne.s32.totalorder %s2029_s24, %s1631_s29  ;;  %s1723_s12 = smov [#allocation8]  }
  0x45   : > { %v1531_v11 = vld [vmem:[%s1872_s6 + $0x4] ss:$8 sps:$4 sm:$0xff]   ;;  %v1524_v13 = vld [vmem:[#allocation6 + $0x10] sm:$0xff]   ;;  %v1529_v18 = vld [vmem:[%s1872_s6] ss:$8 sps:$4 sm:$0xff]   ;;  %s1635_s22 = sshll.u32 %s1723_s12, 4  ;;  %s1636_s22 = int_to_ptr.vmem [resolvable:$false] %s1635_s22 }
  0x46   : > { %v1534_v12 = vld [vmem:[%s1872_s6 + $0x84] ss:$8 sps:$4 sm:$0xff]   ;;  %721 = vmatprep.mubr.bf16.mxu0 %v1531_v11  ;;  %v1532_v19 = vld [vmem:[%s1872_s6 + $0x80] ss:$8 sps:$4 sm:$0xff]   ;;  %v1535_v20 = vld [vmem:[%s1872_s6 + $0x14] ss:$8 sps:$4 sm:$0xff]   ;;  %p1633_p8 = pnand %p1632_p1, %p1838_p13  ;;  %p1638_p0 = scmp.lt.s32.totalorder %s2029_s24, %s1636_s22 }
  0x47   : > { %1309 = vmatpush3.bf16.msra.mxu0 %v1516_v3  ;;  %1427 = vmatpush3.bf16.msra.mxu1 %v1516_v3  ;;  %v1525_v14 = vld [vmem:[#allocation6 + $0x48] sm:$0xff]   ;;  %v1527_v16 = vld [vmem:[#allocation6 + $0x40] sm:$0xff]   ;;  %v1537_v21 = vld [vmem:[%s1872_s6 + $0x94] ss:$8 sps:$4 sm:$0xff]   ;;  %s1637_s1 = scalar_lea.vmem %s1636_s22, 8192 }
  0x48   : > { %1310 = vmatprep.subr.bf16.mxu0 %v1517_v4  ;;  %1420 = vmatprep.subr.bf16.mxu1 %v1517_v4  ;;  %v1526_v15 = vld [vmem:[#allocation6 + $0x8] sm:$0xff]   ;;  %v1528_v17 = vld [vmem:[#allocation6] sm:$0xff]   ;;  %v1539_v22 = vld [vmem:[%s1872_s6 + $0x10] ss:$8 sps:$4 sm:$0xff]   ;;  %p1634_p12 = pneg %p1633_p8  ;;  %p1639_p2 = scmp.lt.s32.totalorder %s1637_s1, %s1631_s29 }
  0x49   : > { %785 = vmatprep.mubr.bf16.mxu1 %v1534_v12  ;;  %v1540_v23 = vld [vmem:[%s1872_s6 + $0x90] ss:$8 sps:$4 sm:$0xff]   ;;  %v1541_v24 = vld [vmem:[%s1872_s6 + $0x24] ss:$8 sps:$4 sm:$0xff]   ;;  %v1545_v26 = vld [vmem:[%s1872_s6 + $0x20] ss:$8 sps:$4 sm:$0xff]  }
  0x4a   : > { %v1543_v25 = vld [vmem:[%s1872_s6 + $0xa4] ss:$8 sps:$4 sm:$0xff]   ;;  %v1546_v27 = vld [vmem:[%s1872_s6 + $0xa0] ss:$8 sps:$4 sm:$0xff]   ;;  %v1547_v28 = vld [vmem:[%s1872_s6 + $0x34] ss:$8 sps:$4 sm:$0xff]   ;;  %p1640_p3 = por %p1639_p2, %p1638_p0 }
  0x4b   : > { %1311 = vmatpush3.bf16.msra.mxu0 %v1518_v5  ;;  %1428 = vmatpush3.bf16.msra.mxu1 %v1518_v5  ;;  %v1549_v29 = vld [vmem:[%s1872_s6 + $0xb4] ss:$8 sps:$4 sm:$0xff]   ;;  %v1551_v30 = vld [vmem:[%s1872_s6 + $0x30] ss:$8 sps:$4 sm:$0xff]   ;;  %v1553_v32 = vld [vmem:[%s1872_s6 + $0x44] ss:$8 sps:$4 sm:$0xff]  }
  0x4c   : > { %1312 = vmatprep.subr.bf16.mxu0 %v1519_v6  ;;  %1421 = vmatprep.subr.bf16.mxu1 %v1519_v6  ;;  %v1552_v31 = vld [vmem:[%s1872_s6 + $0xb0] ss:$8 sps:$4 sm:$0xff]   ;;  %v1555_v33 = vld [vmem:[%s1872_s6 + $0xc4] ss:$8 sps:$4 sm:$0xff]   ;;  %v1557_v34 = vld [vmem:[%s1872_s6 + $0x40] ss:$8 sps:$4 sm:$0xff]   ;;  %p1641_p5 = pnand %p1640_p3, %p1634_p12 }
  0x4d   : > { %v1558_v35 = vld [vmem:[%s1872_s6 + $0xc0] ss:$8 sps:$4 sm:$0xff]   ;;  %v1559_v36 = vld [vmem:[%s1872_s6 + $0x54] ss:$8 sps:$4 sm:$0xff]   ;;  %v1563_v38 = vld [vmem:[%s1872_s6 + $0x50] ss:$8 sps:$4 sm:$0xff]  }
  0x4e   : > { %v1561_v37 = vld [vmem:[%s1872_s6 + $0xd4] ss:$8 sps:$4 sm:$0xff]   ;;  %v1564_v39 = vld [vmem:[%s1872_s6 + $0xd0] ss:$8 sps:$4 sm:$0xff]   ;;  %v1565_v40 = vld [vmem:[%s1872_s6 + $0x64] ss:$8 sps:$4 sm:$0xff]  }
  0x4f   : > { %1313 = vmatpush3.bf16.msra.mxu0 %v1520_v7  ;;  %1429 = vmatpush3.bf16.msra.mxu1 %v1520_v7  ;;  %v1567_v41 = vld [vmem:[%s1872_s6 + $0xe4] ss:$8 sps:$4 sm:$0xff]   ;;  %v1569_v42 = vld [vmem:[%s1872_s6 + $0x60] ss:$8 sps:$4 sm:$0xff]   ;;  %v1571_v44 = vld [vmem:[%s1872_s6 + $0x74] ss:$8 sps:$4 sm:$0xff]  }
  0x50   : > { %1314 = vmatprep.subr.bf16.mxu0 %v1521_v8  ;;  %1422 = vmatprep.subr.bf16.mxu1 %v1521_v8  ;;  %v1570_v43 = vld [vmem:[%s1872_s6 + $0xe0] ss:$8 sps:$4 sm:$0xff]   ;;  %v1573_v45 = vld [vmem:[%s1872_s6 + $0xf4] ss:$8 sps:$4 sm:$0xff]   ;;  %v1575_v46 = vld [vmem:[%s1872_s6 + $0x70] ss:$8 sps:$4 sm:$0xff]  }
  0x51   : > { %v1576_v47 = vld [vmem:[%s1872_s6 + $0xf0] ss:$8 sps:$4 sm:$0xff]   ;;  %v1917_v51 = vld [vmem:[%s2081_s2] ss:$0 sm:$0xff] }
  0x52   : > { %v1922_v55 = vld [vmem:[%s2082_s3] ss:$0 sm:$0xff] }
  0x53   : > { %1315 = vmatpush3.bf16.msra.mxu0 %v1522_v9  ;;  %1430 = vmatpush3.bf16.msra.mxu1 %v1522_v9 }
  0x54   : > { %1316 = vmatprep.subr.bf16.mxu0 %v1523_v10  ;;  %1423 = vmatprep.subr.bf16.mxu1 %v1523_v10 }
  0x57   : > { %1317 = vmatpush3.bf16.msra.mxu0 %v1524_v13  ;;  %1431 = vmatpush3.bf16.msra.mxu1 %v1524_v13 }
  0x58   : > { %1318 = vmatprep.subr.bf16.mxu0 %v1525_v14  ;;  %1424 = vmatprep.subr.bf16.mxu1 %v1525_v14 }
  0x5b   : > { %1319 = vmatpush3.bf16.msra.mxu0 %v1526_v15  ;;  %1432 = vmatpush3.bf16.msra.mxu1 %v1526_v15 }
  0x5c   : > { %1320 = vmatprep.subr.bf16.mxu0 %v1527_v16  ;;  %1425 = vmatprep.subr.bf16.mxu1 %v1527_v16 }
  0x5f   : > { %1321 = vmatpush3.bf16.msra.mxu0 %v1528_v17  ;;  %1433 = vmatpush3.bf16.msra.mxu1 %v1528_v17 }
  0x62   : > { %722 = vmatmul.mubr.bf16.vlgmr.msra.gmra.mxu0 %v1529_v18  ;;  %786 = vmatmul.mubr.bf16.vlgmr.msra.gmra.mxu1 %v1532_v19 }
  0x63   : > { %729 = vmatprep.mubr.bf16.mxu0 %v1535_v20  ;;  %793 = vmatprep.mubr.bf16.mxu1 %v1537_v21 }
  0x6a   : > { %730 = vmatmul.mubr.bf16.gmra.mxu0 %v1539_v22  ;;  %794 = vmatmul.mubr.bf16.gmra.mxu1 %v1540_v23 }
  0x6b   : > { %737 = vmatprep.mubr.bf16.mxu0 %v1541_v24  ;;  %801 = vmatprep.mubr.bf16.mxu1 %v1543_v25 }
  0x72   : > { %738 = vmatmul.mubr.bf16.gmra.mxu0 %v1545_v26  ;;  %802 = vmatmul.mubr.bf16.gmra.mxu1 %v1546_v27 }
  0x73   : > { %745 = vmatprep.mubr.bf16.mxu0 %v1547_v28  ;;  %809 = vmatprep.mubr.bf16.mxu1 %v1549_v29 }
  0x7a   : > { %746 = vmatmul.mubr.bf16.gmra.mxu0 %v1551_v30  ;;  %810 = vmatmul.mubr.bf16.gmra.mxu1 %v1552_v31 }
  0x7b   : > { %753 = vmatprep.mubr.bf16.mxu0 %v1553_v32  ;;  %817 = vmatprep.mubr.bf16.mxu1 %v1555_v33 }
  0x82   : > { %754 = vmatmul.mubr.bf16.gmra.mxu0 %v1557_v34  ;;  %818 = vmatmul.mubr.bf16.gmra.mxu1 %v1558_v35 }
  0x83   : > { %761 = vmatprep.mubr.bf16.mxu0 %v1559_v36  ;;  %825 = vmatprep.mubr.bf16.mxu1 %v1561_v37 }
  0x8a   : > { %762 = vmatmul.mubr.bf16.gmra.mxu0 %v1563_v38  ;;  %826 = vmatmul.mubr.bf16.gmra.mxu1 %v1564_v39 }
  0x8b   : > { %769 = vmatprep.mubr.bf16.mxu0 %v1565_v40  ;;  %833 = vmatprep.mubr.bf16.mxu1 %v1567_v41 }
  0x92   : > { %770 = vmatmul.mubr.bf16.gmra.mxu0 %v1569_v42  ;;  %834 = vmatmul.mubr.bf16.gmra.mxu1 %v1570_v43 }
  0x93   : > { %777 = vmatprep.mubr.bf16.mxu0 %v1571_v44  ;;  %841 = vmatprep.mubr.bf16.mxu1 %v1573_v45 }
  0x9a   : > { %778 = vmatmul.mubr.bf16.gmra.mxu0 %v1575_v46  ;;  %842 = vmatmul.mubr.bf16.gmra.mxu1 %v1576_v47 }
 0x122   : > { %v1322_v48 = vpop.f32.mrf.mxu0  ;;  %v1370_v49 = vpop.f32.mrf.mxu1 }
 0x124   : > { %v1323_v50 = vpop.f32.mrf.mxu0  ;;  %v1371_v52 = vpop.f32.mrf.mxu1 }
 0x125   : > { %v1324_v53 = vadd.f32 %v1323_v50, %v1322_v48  ;;  %v1372_v54 = vadd.f32 %v1371_v52, %v1370_v49 }
 0x126   : > { %v1325_v56 = vpop.f32.mrf.mxu0  ;;  %v1373_v57 = vpop.f32.mrf.mxu1 }
 0x127   : > { %v956_v58 = vmul.f32 %v1324_v53, %v1917_v51  ;;  %v972_v59 = vmul.f32 %v1372_v54, %v1917_v51 }
 0x128   : > { %v1326_v60 = vpop.f32.mrf.mxu0  ;;  %v1374_v61 = vpop.f32.mrf.mxu1 }
 0x129   : > { %v995_v62 = vadd.f32 %v1922_v55, %v956_v58  ;;  %v1011_v63 = vadd.f32 %v1922_v55, %v972_v59  ;;  %v1327_v0 = vadd.f32 %v1326_v60, %v1325_v56  ;;  %v1375_v1 = vadd.f32 %v1374_v61, %v1373_v57 }
 0x12a   : > { %v1328_v2 = vpop.f32.mrf.mxu0  ;;  %v1376_v3 = vpop.f32.mrf.mxu1 }
 0x12b   : > { %v1027_v4 = vmax.f32 %v995_v62, 0.0  ;;  %v1043_v5 = vmax.f32 %v1011_v63, 0.0  ;;  %v957_v6 = vmul.f32 %v1327_v0, %v1917_v51  ;;  %v973_v7 = vmul.f32 %v1375_v1, %v1917_v51 }
 0x12c   : > { %v1329_v8 = vpop.f32.mrf.mxu0  ;;  %v1377_v9 = vpop.f32.mrf.mxu1 }
 0x12d   : > { %1059 = vst [vmem:[%s1932_s8] sm:$0xff] %v1027_v4  ;;  %1075 = vst [vmem:[%s1932_s8 + $0x80] sm:$0xff] %v1043_v5  ;;  %v996_v10 = vadd.f32 %v1922_v55, %v957_v6  ;;  %v1012_v11 = vadd.f32 %v1922_v55, %v973_v7  ;;  %v1330_v12 = vadd.f32 %v1329_v8, %v1328_v2 }
 0x12e   : > { %v1378_v13 = vadd.f32 %v1377_v9, %v1376_v3  ;;  %v1331_v14 = vpop.f32.mrf.mxu0  ;;  %v1379_v15 = vpop.f32.mrf.mxu1 }
 0x12f   : > { %v1028_v16 = vmax.f32 %v996_v10, 0.0  ;;  %v1044_v17 = vmax.f32 %v1012_v11, 0.0  ;;  %v958_v18 = vmul.f32 %v1330_v12, %v1917_v51 }
 0x130   : > { %v974_v19 = vmul.f32 %v1378_v13, %v1917_v51  ;;  %v1332_v20 = vpop.f32.mrf.mxu0  ;;  %v1380_v21 = vpop.f32.mrf.mxu1 }
 0x131   : > { %1060 = vst [vmem:[%s1932_s8 + $0x8] sm:$0xff] %v1028_v16  ;;  %1076 = vst [vmem:[%s1932_s8 + $0x88] sm:$0xff] %v1044_v17  ;;  %v997_v22 = vadd.f32 %v1922_v55, %v958_v18  ;;  %v1333_v24 = vadd.f32 %v1332_v20, %v1331_v14  ;;  %v1381_v25 = vadd.f32 %v1380_v21, %v1379_v15 }
 0x132   : > { %v1013_v23 = vadd.f32 %v1922_v55, %v974_v19  ;;  %v1334_v26 = vpop.f32.mrf.mxu0  ;;  %v1382_v27 = vpop.f32.mrf.mxu1 }
 0x133   : > { %v1029_v28 = vmax.f32 %v997_v22, 0.0  ;;  %v959_v30 = vmul.f32 %v1333_v24, %v1917_v51  ;;  %v975_v31 = vmul.f32 %v1381_v25, %v1917_v51 }
 0x134   : > { %v1045_v29 = vmax.f32 %v1013_v23, 0.0  ;;  %v1335_v32 = vpop.f32.mrf.mxu0  ;;  %v1383_v33 = vpop.f32.mrf.mxu1 }
 0x135   : > { %1061 = vst [vmem:[%s1932_s8 + $0x10] sm:$0xff] %v1029_v28  ;;  %v998_v34 = vadd.f32 %v1922_v55, %v959_v30  ;;  %v1014_v35 = vadd.f32 %v1922_v55, %v975_v31  ;;  %v1336_v36 = vadd.f32 %v1335_v32, %v1334_v26  ;;  %v1384_v37 = vadd.f32 %v1383_v33, %v1382_v27 }
 0x136   : > { %1077 = vst [vmem:[%s1932_s8 + $0x90] sm:$0xff] %v1045_v29  ;;  %v1337_v38 = vpop.f32.mrf.mxu0  ;;  %v1385_v39 = vpop.f32.mrf.mxu1 }
 0x137   : > { %v1030_v40 = vmax.f32 %v998_v34, 0.0  ;;  %v1046_v41 = vmax.f32 %v1014_v35, 0.0  ;;  %v960_v42 = vmul.f32 %v1336_v36, %v1917_v51  ;;  %v976_v43 = vmul.f32 %v1384_v37, %v1917_v51 }
 0x138   : > { %v1338_v44 = vpop.f32.mrf.mxu0  ;;  %v1386_v45 = vpop.f32.mrf.mxu1 }
 0x139   : > { %1062 = vst [vmem:[%s1932_s8 + $0x18] sm:$0xff] %v1030_v40  ;;  %1078 = vst [vmem:[%s1932_s8 + $0x98] sm:$0xff] %v1046_v41  ;;  %v999_v46 = vadd.f32 %v1922_v55, %v960_v42  ;;  %v1015_v47 = vadd.f32 %v1922_v55, %v976_v43  ;;  %v1339_v48 = vadd.f32 %v1338_v44, %v1337_v38 }
 0x13a   : > { %v1387_v49 = vadd.f32 %v1386_v45, %v1385_v39  ;;  %v1340_v50 = vpop.f32.mrf.mxu0  ;;  %v1388_v52 = vpop.f32.mrf.mxu1 }
 0x13b   : > { %v1031_v53 = vmax.f32 %v999_v46, 0.0  ;;  %v1047_v54 = vmax.f32 %v1015_v47, 0.0  ;;  %v961_v56 = vmul.f32 %v1339_v48, %v1917_v51 }
 0x13c   : > { %v977_v57 = vmul.f32 %v1387_v49, %v1917_v51  ;;  %v1341_v58 = vpop.f32.mrf.mxu0  ;;  %v1389_v59 = vpop.f32.mrf.mxu1 }
 0x13d   : > { %1063 = vst [vmem:[%s1932_s8 + $0x20] sm:$0xff] %v1031_v53  ;;  %1079 = vst [vmem:[%s1932_s8 + $0xa0] sm:$0xff] %v1047_v54  ;;  %v1000_v60 = vadd.f32 %v1922_v55, %v961_v56  ;;  %v1342_v62 = vadd.f32 %v1341_v58, %v1340_v50  ;;  %v1390_v63 = vadd.f32 %v1389_v59, %v1388_v52 }
 0x13e   : > { %v1016_v61 = vadd.f32 %v1922_v55, %v977_v57  ;;  %v1343_v0 = vpop.f32.mrf.mxu0  ;;  %v1391_v1 = vpop.f32.mrf.mxu1 }
 0x13f   : > { %v1032_v2 = vmax.f32 %v1000_v60, 0.0  ;;  %v962_v4 = vmul.f32 %v1342_v62, %v1917_v51  ;;  %v978_v5 = vmul.f32 %v1390_v63, %v1917_v51 }
 0x140   : > { %v1048_v3 = vmax.f32 %v1016_v61, 0.0  ;;  %v1344_v6 = vpop.f32.mrf.mxu0  ;;  %v1392_v7 = vpop.f32.mrf.mxu1 }
 0x141   : > { %1064 = vst [vmem:[%s1932_s8 + $0x28] sm:$0xff] %v1032_v2  ;;  %v1001_v8 = vadd.f32 %v1922_v55, %v962_v4  ;;  %v1017_v9 = vadd.f32 %v1922_v55, %v978_v5  ;;  %v1345_v10 = vadd.f32 %v1344_v6, %v1343_v0  ;;  %v1393_v11 = vadd.f32 %v1392_v7, %v1391_v1 }
 0x142   : > { %1080 = vst [vmem:[%s1932_s8 + $0xa8] sm:$0xff] %v1048_v3  ;;  %v1346_v12 = vpop.f32.mrf.mxu0  ;;  %v1394_v13 = vpop.f32.mrf.mxu1 }
 0x143   : > { %v1033_v14 = vmax.f32 %v1001_v8, 0.0  ;;  %v1049_v15 = vmax.f32 %v1017_v9, 0.0  ;;  %v963_v16 = vmul.f32 %v1345_v10, %v1917_v51  ;;  %v979_v17 = vmul.f32 %v1393_v11, %v1917_v51 }
 0x144   : > { %v1347_v18 = vpop.f32.mrf.mxu0  ;;  %v1395_v19 = vpop.f32.mrf.mxu1 }
 0x145   : > { %1065 = vst [vmem:[%s1932_s8 + $0x30] sm:$0xff] %v1033_v14  ;;  %1081 = vst [vmem:[%s1932_s8 + $0xb0] sm:$0xff] %v1049_v15  ;;  %v1002_v20 = vadd.f32 %v1922_v55, %v963_v16  ;;  %v1018_v21 = vadd.f32 %v1922_v55, %v979_v17  ;;  %v1348_v22 = vadd.f32 %v1347_v18, %v1346_v12 }
 0x146   : > { %v1396_v23 = vadd.f32 %v1395_v19, %v1394_v13  ;;  %v1349_v24 = vpop.f32.mrf.mxu0  ;;  %v1397_v25 = vpop.f32.mrf.mxu1 }
 0x147   : > { %v1034_v26 = vmax.f32 %v1002_v20, 0.0  ;;  %v1050_v27 = vmax.f32 %v1018_v21, 0.0  ;;  %v964_v28 = vmul.f32 %v1348_v22, %v1917_v51 }
 0x148   : > { %v980_v29 = vmul.f32 %v1396_v23, %v1917_v51  ;;  %v1350_v30 = vpop.f32.mrf.mxu0  ;;  %v1398_v31 = vpop.f32.mrf.mxu1 }
 0x149   : > { %1066 = vst [vmem:[%s1932_s8 + $0x38] sm:$0xff] %v1034_v26  ;;  %1082 = vst [vmem:[%s1932_s8 + $0xb8] sm:$0xff] %v1050_v27  ;;  %v1003_v32 = vadd.f32 %v1922_v55, %v964_v28  ;;  %v1351_v34 = vadd.f32 %v1350_v30, %v1349_v24  ;;  %v1399_v35 = vadd.f32 %v1398_v31, %v1397_v25 }
 0x14a   : > { %v1019_v33 = vadd.f32 %v1922_v55, %v980_v29  ;;  %v1352_v36 = vpop.f32.mrf.mxu0  ;;  %v1400_v37 = vpop.f32.mrf.mxu1 }
 0x14b   : > { %v1035_v38 = vmax.f32 %v1003_v32, 0.0  ;;  %v965_v40 = vmul.f32 %v1351_v34, %v1917_v51  ;;  %v981_v41 = vmul.f32 %v1399_v35, %v1917_v51 }
 0x14c   : > { %v1051_v39 = vmax.f32 %v1019_v33, 0.0  ;;  %v1353_v42 = vpop.f32.mrf.mxu0  ;;  %v1401_v43 = vpop.f32.mrf.mxu1 }
 0x14d   : > { %1067 = vst [vmem:[%s1932_s8 + $0x40] sm:$0xff] %v1035_v38  ;;  %v1004_v44 = vadd.f32 %v1922_v55, %v965_v40  ;;  %v1020_v45 = vadd.f32 %v1922_v55, %v981_v41  ;;  %v1354_v46 = vadd.f32 %v1353_v42, %v1352_v36  ;;  %v1402_v47 = vadd.f32 %v1401_v43, %v1400_v37 }
 0x14e   : > { %1083 = vst [vmem:[%s1932_s8 + $0xc0] sm:$0xff] %v1051_v39  ;;  %v1355_v48 = vpop.f32.mrf.mxu0  ;;  %v1403_v49 = vpop.f32.mrf.mxu1 }
 0x14f   : > { %v1036_v50 = vmax.f32 %v1004_v44, 0.0  ;;  %v1052_v52 = vmax.f32 %v1020_v45, 0.0  ;;  %v966_v53 = vmul.f32 %v1354_v46, %v1917_v51  ;;  %v982_v54 = vmul.f32 %v1402_v47, %v1917_v51 }
 0x150   : > { %v1356_v56 = vpop.f32.mrf.mxu0  ;;  %v1404_v57 = vpop.f32.mrf.mxu1 }
 0x151   : > { %1068 = vst [vmem:[%s1932_s8 + $0x48] sm:$0xff] %v1036_v50  ;;  %1084 = vst [vmem:[%s1932_s8 + $0xc8] sm:$0xff] %v1052_v52  ;;  %v1005_v58 = vadd.f32 %v1922_v55, %v966_v53  ;;  %v1021_v59 = vadd.f32 %v1922_v55, %v982_v54  ;;  %v1357_v60 = vadd.f32 %v1356_v56, %v1355_v48 }
 0x152   : > { %v1405_v61 = vadd.f32 %v1404_v57, %v1403_v49  ;;  %v1358_v62 = vpop.f32.mrf.mxu0  ;;  %v1406_v63 = vpop.f32.mrf.mxu1 }
 0x153   : > { %v1037_v0 = vmax.f32 %v1005_v58, 0.0  ;;  %v1053_v1 = vmax.f32 %v1021_v59, 0.0  ;;  %v967_v2 = vmul.f32 %v1357_v60, %v1917_v51 }
 0x154   : > { %v983_v3 = vmul.f32 %v1405_v61, %v1917_v51  ;;  %v1359_v4 = vpop.f32.mrf.mxu0  ;;  %v1407_v5 = vpop.f32.mrf.mxu1 }
 0x155   : > { %1069 = vst [vmem:[%s1932_s8 + $0x50] sm:$0xff] %v1037_v0  ;;  %1085 = vst [vmem:[%s1932_s8 + $0xd0] sm:$0xff] %v1053_v1  ;;  %v1006_v6 = vadd.f32 %v1922_v55, %v967_v2  ;;  %v1360_v8 = vadd.f32 %v1359_v4, %v1358_v62  ;;  %v1408_v9 = vadd.f32 %v1407_v5, %v1406_v63 }
 0x156   : > { %v1022_v7 = vadd.f32 %v1922_v55, %v983_v3  ;;  %v1361_v10 = vpop.f32.mrf.mxu0  ;;  %v1409_v11 = vpop.f32.mrf.mxu1 }
 0x157   : > { %v1038_v12 = vmax.f32 %v1006_v6, 0.0  ;;  %v968_v14 = vmul.f32 %v1360_v8, %v1917_v51  ;;  %v984_v15 = vmul.f32 %v1408_v9, %v1917_v51 }
 0x158   : > { %v1054_v13 = vmax.f32 %v1022_v7, 0.0  ;;  %v1362_v16 = vpop.f32.mrf.mxu0  ;;  %v1410_v17 = vpop.f32.mrf.mxu1 }
 0x159   : > { %1070 = vst [vmem:[%s1932_s8 + $0x58] sm:$0xff] %v1038_v12  ;;  %v1007_v18 = vadd.f32 %v1922_v55, %v968_v14  ;;  %v1023_v19 = vadd.f32 %v1922_v55, %v984_v15  ;;  %v1363_v20 = vadd.f32 %v1362_v16, %v1361_v10  ;;  %v1411_v21 = vadd.f32 %v1410_v17, %v1409_v11 }
 0x15a   : > { %1086 = vst [vmem:[%s1932_s8 + $0xd8] sm:$0xff] %v1054_v13  ;;  %v1364_v22 = vpop.f32.mrf.mxu0  ;;  %v1412_v23 = vpop.f32.mrf.mxu1 }
 0x15b   : > { %v1039_v24 = vmax.f32 %v1007_v18, 0.0  ;;  %v1055_v25 = vmax.f32 %v1023_v19, 0.0  ;;  %v969_v26 = vmul.f32 %v1363_v20, %v1917_v51  ;;  %v985_v27 = vmul.f32 %v1411_v21, %v1917_v51 }
 0x15c   : > { %v1365_v28 = vpop.f32.mrf.mxu0  ;;  %v1413_v29 = vpop.f32.mrf.mxu1 }
 0x15d   : > { %1071 = vst [vmem:[%s1932_s8 + $0x60] sm:$0xff] %v1039_v24  ;;  %1087 = vst [vmem:[%s1932_s8 + $0xe0] sm:$0xff] %v1055_v25  ;;  %v1008_v30 = vadd.f32 %v1922_v55, %v969_v26  ;;  %v1024_v31 = vadd.f32 %v1922_v55, %v985_v27  ;;  %v1366_v32 = vadd.f32 %v1365_v28, %v1364_v22 }
 0x15e   : > { %v1414_v33 = vadd.f32 %v1413_v29, %v1412_v23  ;;  %v1367_v34 = vpop.f32.mrf.mxu0  ;;  %v1415_v35 = vpop.f32.mrf.mxu1 }
 0x15f   : > { %v1040_v36 = vmax.f32 %v1008_v30, 0.0  ;;  %v1056_v37 = vmax.f32 %v1024_v31, 0.0  ;;  %v970_v38 = vmul.f32 %v1366_v32, %v1917_v51 }
 0x160   : > { %v986_v39 = vmul.f32 %v1414_v33, %v1917_v51  ;;  %v1368_v40 = vpop.f32.mrf.mxu0  ;;  %v1416_v41 = vpop.f32.mrf.mxu1 }
 0x161   : > { %1072 = vst [vmem:[%s1932_s8 + $0x68] sm:$0xff] %v1040_v36  ;;  %1088 = vst [vmem:[%s1932_s8 + $0xe8] sm:$0xff] %v1056_v37  ;;  %v1009_v42 = vadd.f32 %v1922_v55, %v970_v38  ;;  %v1369_v44 = vadd.f32 %v1368_v40, %v1367_v34  ;;  %v1417_v45 = vadd.f32 %v1416_v41, %v1415_v35 }
 0x162   : > { %v1025_v43 = vadd.f32 %v1922_v55, %v986_v39 }
 0x163   : > { %v1041_v46 = vmax.f32 %v1009_v42, 0.0  ;;  %v971_v48 = vmul.f32 %v1369_v44, %v1917_v51  ;;  %v987_v49 = vmul.f32 %v1417_v45, %v1917_v51 }
 0x164   : > { %v1057_v47 = vmax.f32 %v1025_v43, 0.0 }
 0x165   : > { %1073 = vst [vmem:[%s1932_s8 + $0x70] sm:$0xff] %v1041_v46  ;;  %v1010_v50 = vadd.f32 %v1922_v55, %v971_v48  ;;  %v1026_v52 = vadd.f32 %v1922_v55, %v987_v49 }
 0x166   : > { %1089 = vst [vmem:[%s1932_s8 + $0xf0] sm:$0xff] %v1057_v47 }
 0x167   : > { %v1042_v51 = vmax.f32 %v1010_v50, 0.0  ;;  %v1058_v53 = vmax.f32 %v1026_v52, 0.0 }
 0x169   : > { %1074 = vst [vmem:[%s1932_s8 + $0x78] sm:$0xff] %v1042_v51  ;;  %1090 = vst [vmem:[%s1932_s8 + $0xf8] sm:$0xff] %v1058_v53 }
 0x16a   : > { %1644 = shalt.err (!%p1641_p5)
}
 0x16b   : > { %s1645_s30 = scalar_lea.hbm %s2027_s11, 4096  ;;  %s1649_s25 = scalar_lea.hbm %s2083_s4, 8192 }
 0x16c   : > { %p1646_p7 = scmp.ne.s32.totalorder %s2027_s11, %s1645_s30  ;;  %p1650_p9 = scmp.lt.s32.totalorder %s2027_s11, %s2083_s4 }
 0x16d   : > { %p1651_p11 = scmp.lt.s32.totalorder %s1649_s25, %s1645_s30 }
 0x16e   : > { %p1647_p6 = pnand %p1646_p7, %p1838_p13 }
 0x16f   : > { %p1652_p10 = por %p1651_p11, %p1650_p9 }
 0x170   : > { %p1648_p4 = pneg %p1647_p6 }
 0x172   : > { %p1653_p1 = pnand %p1652_p10, %p1648_p4 }
 0x174   : > { %1656 = shalt.err (!%p1653_p1)
}
 0x175   : > { %s1724_s8 = smov 128   ;;  %s1725_s9 = smov 8  }
 0x176   : > { %1440 = dma.vmem_to_hbm [thread:$0]  (%p1838_p13), %s2029_s24, 4096, %s2027_s11, %s1092_s18, %s1724_s8, %s1724_s8, %s1725_s9  }
 0x177 PF: > { %s1121_s10 = sand.u32 1, %s1695_s15   ;;  %p2097_p8 = scmp.ne.s32.totalorder %s2089_s26, 0 }
 0x178   : > { %p2098_p12 = scmp.ge.s32.totalorder %s1715_s20, 2  ;;  %s1122_s14 = scalar_lea.sflag [#allocation5], %s1121_s10 }
 0x17a   : > { %p1451_p0 = pnand %p2098_p12, %p2097_p8 }
 0x17c   : > { %p1452_p2 = pneg %p1451_p0 }
 0x17e   : > { %1690 = dma.done.wait (%p1452_p2), %s1122_s14, 4096  }
 0x17f   : > { %1692 = vsyncadd (%p1452_p2), %s1122_s14, 4294963200  ;;  %s21_s20 = sadd.s32 1, %s1715_s20   ;;  %s2099_s15 = smov %s1699_s16 }
 0x180   : > { %p18_p3 = scmp.ge.s32.totalorder %s21_s20, 4   ;;  %s2100_s16 = smov %s1703_s17 }
 0x181   : > { %s2101_s17 = smov %s1847_s28  ;;  %s2102_s18 = smov %s1711_s19 }
 0x182   : > { %s2103_s19 = smov %s2105_s5  ;;  %20 = sbr.rel (!%p18_p3) target bundleno = 9 (0x9), region = 100 }
 0x187   :  { %1127 = vsyncpa [#allocation4], 1 }
 0x188   :  { %1129 = vsyncpa [#allocation4 + $0x1], 1 }
 0x189   :  { %1130 = vsyncpa [#allocation7], 1 }
 0x18a   :  { %1131 = vsyncpa [#allocation5], 1 }
 0x18b   :  { %1133 = vsyncpa [#allocation5 + $0x1], 1 }

</bundles_post_ra>
